<compile_context>
chip_gen: v6e
topology: v6e:2x2x1
jax: 0.10.0
libtpu: 0.0.40
codegen_flags: <defaults>
</compile_context>

<pallas_src>
import functools

import jax
import jax.numpy as jnp
from jax.experimental import pallas as pl
from jax.experimental.pallas import tpu as pltpu

INPUT_SIZE = 784
HIDDEN_SIZE = 100
NUM_CLASSES = 10

# Lane-aligned (128-lane vreg / MXU column) padded sizes.
HIDDEN_PAD = 128
OUT_PAD = 128


def mlp_kernel(x_ref, w1_ref, b1_ref, w2_ref, b2_ref, o_ref):
    # Linear 1 on the MXU: (TB, 784) bf16 @ (784, 128) bf16 -> f32 accumulate.
    h = jnp.dot(x_ref[...], w1_ref[...], preferred_element_type=jnp.float32)
    # Bias + ReLU in f32 on the VPU (correct for v5e which lacks bf16 VPU ops).
    h = jnp.maximum(h + b1_ref[...], 0.0)
    # Linear 2 on the MXU: (TB, 128) bf16 @ (128, 128) bf16 -> f32 accumulate.
    out = jnp.dot(h.astype(w2_ref.dtype), w2_ref[...],
                  preferred_element_type=jnp.float32)
    o_ref[...] = (out + b2_ref[...]).astype(o_ref.dtype)


def _round_up(x, m):
    return ((x + m - 1) // m) * m


@functools.partial(jax.jit, static_argnames=("tile_b",))
def neuralnetwork_forward(x, w1, b1, w2, b2, tile_b=512):
    """x: (B, 784) f32. w1: (784, 100), b1: (100,), w2: (100, 10), b2: (10,).
    Returns (B, 10) f32 — same math as Linear -> ReLU -> Linear."""
    B = x.shape[0]

    # --- Zero-pad params to lane-dense shapes; cast weights to bf16. ---
    w1p = jnp.zeros((INPUT_SIZE, HIDDEN_PAD), jnp.bfloat16)
    w1p = w1p.at[:, :HIDDEN_SIZE].set(w1.astype(jnp.bfloat16))
    b1p = jnp.zeros((1, HIDDEN_PAD), jnp.float32)
    b1p = b1p.at[:, :HIDDEN_SIZE].set(b1.reshape(1, HIDDEN_SIZE).astype(jnp.float32))
    w2p = jnp.zeros((HIDDEN_PAD, OUT_PAD), jnp.bfloat16)
    w2p = w2p.at[:HIDDEN_SIZE, :NUM_CLASSES].set(w2.astype(jnp.bfloat16))
    b2p = jnp.zeros((1, OUT_PAD), jnp.float32)
    b2p = b2p.at[:, :NUM_CLASSES].set(b2.reshape(1, NUM_CLASSES).astype(jnp.float32))

    # --- Batch tiling: tile is a multiple of 8 sublanes, batch padded to tile multiple. ---
    tb = min(tile_b, _round_up(B, 8))
    bp = _round_up(B, tb)
    xp = jnp.zeros((bp, INPUT_SIZE), jnp.bfloat16).at[:B].set(x.astype(jnp.bfloat16))

    grid = (bp // tb,)
    flops = 2 * bp * (INPUT_SIZE * HIDDEN_PAD + HIDDEN_PAD * OUT_PAD)
    bytes_accessed = (xp.size * 2 + w1p.size * 2 + w2p.size * 2
                      + b1p.size * 4 + b2p.size * 4 + bp * OUT_PAD * 4)

    out = pl.pallas_call(
        mlp_kernel,
        out_shape=jax.ShapeDtypeStruct((bp, OUT_PAD), jnp.float32),
        grid=grid,
        in_specs=[
            pl.BlockSpec((tb, INPUT_SIZE), lambda i: (i, 0)),          # x tile (pipelined)
            pl.BlockSpec((INPUT_SIZE, HIDDEN_PAD), lambda i: (0, 0)),  # w1 resident
            pl.BlockSpec((1, HIDDEN_PAD), lambda i: (0, 0)),           # b1 resident
            pl.BlockSpec((HIDDEN_PAD, OUT_PAD), lambda i: (0, 0)),     # w2 resident
            pl.BlockSpec((1, OUT_PAD), lambda i: (0, 0)),              # b2 resident
        ],
        out_specs=pl.BlockSpec((tb, OUT_PAD), lambda i: (i, 0)),
        compiler_params=pltpu.CompilerParams(
            dimension_semantics=("parallel",)),
        cost_estimate=pl.CostEstimate(flops=flops, transcendentals=0,
                                      bytes_accessed=bytes_accessed),
    )(xp, w1p, b1p, w2p, b2p)

    return out[:B, :NUM_CLASSES]


def init_params(key):
    """Deterministic init mirroring nn.Linear's U(-1/sqrt(fan_in), 1/sqrt(fan_in)).
    Weights stored as (in_features, out_features) so the kernel matmuls are un-transposed."""
    k1, k2, k3, k4 = jax.random.split(key, 4)
    bound1 = 1.0 / jnp.sqrt(jnp.float32(INPUT_SIZE))
    bound2 = 1.0 / jnp.sqrt(jnp.float32(HIDDEN_SIZE))
    w1 = jax.random.uniform(k1, (INPUT_SIZE, HIDDEN_SIZE), jnp.float32, -bound1, bound1)
    b1 = jax.random.uniform(k2, (HIDDEN_SIZE,), jnp.float32, -bound1, bound1)
    w2 = jax.random.uniform(k3, (HIDDEN_SIZE, NUM_CLASSES), jnp.float32, -bound2, bound2)
    b2 = jax.random.uniform(k4, (NUM_CLASSES,), jnp.float32, -bound2, bound2)
    return w1, b1, w2, b2


if __name__ == "__main__":
    key = jax.random.PRNGKey(0)
    kx, kp = jax.random.split(key)
    B = 8
    x = jax.random.normal(kx, (B, INPUT_SIZE), jnp.float32)
    w1, b1, w2, b2 = init_params(kp)

    out = neuralnetwork_forward(x, w1, b1, w2, b2)
    out = jax.block_until_ready(out)
    assert out.shape == (B, NUM_CLASSES)

    # Tight reference mimicking the kernel's bf16 weight/activation casts (f32 accumulate).
    xb = x.astype(jnp.bfloat16).astype(jnp.float32)
    w1b = w1.astype(jnp.bfloat16).astype(jnp.float32)
    w2b = w2.astype(jnp.bfloat16).astype(jnp.float32)
    h_ref = jnp.maximum(xb @ w1b + b1[None, :], 0.0)
    ref_bf16 = h_ref.astype(jnp.bfloat16).astype(jnp.float32) @ w2b + b2[None, :]
    assert jnp.allclose(out, ref_bf16, atol=1e-3, rtol=1e-3)

    # Loose check against the pure-f32 PyTorch-equivalent forward.
    ref_f32 = jnp.maximum(x @ w1 + b1[None, :], 0.0) @ w2 + b2[None, :]
    assert jnp.allclose(out, ref_f32, atol=5e-2, rtol=5e-2)

    print("KERNEL_OK")
</pallas_src>

<mosaic_0001>
module attributes {stable_mosaic.version = 11 : i64} {
  func.func @mlp_kernel(%arg0: i32, %arg1: memref<8x784xbf16, #tpu.memory_space<vmem>>, %arg2: memref<784x128xbf16, #tpu.memory_space<vmem>>, %arg3: memref<1x128xf32, #tpu.memory_space<vmem>>, %arg4: memref<128x128xbf16, #tpu.memory_space<vmem>>, %arg5: memref<1x128xf32, #tpu.memory_space<vmem>>, %arg6: memref<8x128xf32, #tpu.memory_space<vmem>>) attributes {dimension_semantics = [#tpu.dimension_semantics<parallel>], iteration_bounds = array<i64: 1>, scalar_prefetch = 0 : i64, scratch_operands = 0 : i64, tpu.core_type = #tpu.core_type<tc>, window_params = [{transform_indices = @transform_0, window_bounds = array<i64: 8, 784>}, {pipeline_mode = #tpu.pipeline_mode<synchronous>, transform_indices = @transform_1, window_bounds = array<i64: 784, 128>}, {pipeline_mode = #tpu.pipeline_mode<synchronous>, transform_indices = @transform_2, window_bounds = array<i64: 1, 128>}, {pipeline_mode = #tpu.pipeline_mode<synchronous>, transform_indices = @transform_3, window_bounds = array<i64: 128, 128>}, {pipeline_mode = #tpu.pipeline_mode<synchronous>, transform_indices = @transform_4, window_bounds = array<i64: 1, 128>}, {transform_indices = @transform_5, window_bounds = array<i64: 8, 128>}]} {
    %c0 = arith.constant 0 : index
    %c0_0 = arith.constant 0 : index
    %0 = vector.load %arg1[%c0, %c0_0] : memref<8x784xbf16, #tpu.memory_space<vmem>>, vector<8x784xbf16>
    %c0_1 = arith.constant 0 : index
    %c0_2 = arith.constant 0 : index
    %1 = vector.load %arg2[%c0_1, %c0_2] : memref<784x128xbf16, #tpu.memory_space<vmem>>, vector<784x128xbf16>
    %cst = arith.constant dense<0.000000e+00> : vector<8x128xf32>
    %2 = tpu.matmul %0, %1, %cst {dimension_numbers = #tpu.dot_dimension_numbers<[1], [0], [0], [1], [0, 0, 1, 1], [], []>} : vector<8x784xbf16>, vector<784x128xbf16>, vector<8x128xf32> -> vector<8x128xf32>
    %c0_3 = arith.constant 0 : index
    %c0_4 = arith.constant 0 : index
    %3 = vector.load %arg3[%c0_3, %c0_4] : memref<1x128xf32, #tpu.memory_space<vmem>>, vector<1x128xf32>
    %4 = vector.broadcast %3 : vector<1x128xf32> to vector<8x128xf32>
    %5 = arith.addf %2, %4 : vector<8x128xf32>
    %cst_5 = arith.constant 0.000000e+00 : f32
    %6 = vector.broadcast %cst_5 : f32 to vector<8x128xf32>
    %7 = arith.maximumf %5, %6 : vector<8x128xf32>
    %8 = arith.truncf %7 : vector<8x128xf32> to vector<8x128xbf16>
    %c0_6 = arith.constant 0 : index
    %c0_7 = arith.constant 0 : index
    %9 = vector.load %arg4[%c0_6, %c0_7] : memref<128x128xbf16, #tpu.memory_space<vmem>>, vector<128x128xbf16>
    %cst_8 = arith.constant dense<0.000000e+00> : vector<8x128xf32>
    %10 = tpu.matmul %8, %9, %cst_8 {dimension_numbers = #tpu.dot_dimension_numbers<[1], [0], [0], [1], [0, 0, 1, 1], [], []>} : vector<8x128xbf16>, vector<128x128xbf16>, vector<8x128xf32> -> vector<8x128xf32>
    %c0_9 = arith.constant 0 : index
    %c0_10 = arith.constant 0 : index
    %11 = vector.load %arg5[%c0_9, %c0_10] : memref<1x128xf32, #tpu.memory_space<vmem>>, vector<1x128xf32>
    %12 = vector.broadcast %11 : vector<1x128xf32> to vector<8x128xf32>
    %13 = arith.addf %10, %12 : vector<8x128xf32>
    %c0_11 = arith.constant 0 : index
    %c0_12 = arith.constant 0 : index
    %14 = vector.load %arg6[%c0_11, %c0_12] : memref<8x128xf32, #tpu.memory_space<vmem>>, vector<8x128xf32>
    tpu.vector_store %arg6[%c0_11, %c0_12], %13 {strides = array<i32>} : memref<8x128xf32, #tpu.memory_space<vmem>>, vector<8x128xf32>,
    return
  }
  func.func @transform_0(%arg0: i32) -> (i32, i32) {
    %c0_i32 = arith.constant 0 : i32
    %c0_i32_0 = arith.constant 0 : i32
    return %arg0, %c0_i32 : i32, i32
  }
  func.func @transform_1(%arg0: i32) -> (i32, i32) {
    %c0_i32 = arith.constant 0 : i32
    %c0_i32_0 = arith.constant 0 : i32
    %c0_i32_1 = arith.constant 0 : i32
    return %c0_i32, %c0_i32_0 : i32, i32
  }
  func.func @transform_2(%arg0: i32) -> (i32, i32) {
    %c0_i32 = arith.constant 0 : i32
    %c0_i32_0 = arith.constant 0 : i32
    %c0_i32_1 = arith.constant 0 : i32
    return %c0_i32, %c0_i32_0 : i32, i32
  }
  func.func @transform_3(%arg0: i32) -> (i32, i32) {
    %c0_i32 = arith.constant 0 : i32
    %c0_i32_0 = arith.constant 0 : i32
    %c0_i32_1 = arith.constant 0 : i32
    return %c0_i32, %c0_i32_0 : i32, i32
  }
  func.func @transform_4(%arg0: i32) -> (i32, i32) {
    %c0_i32 = arith.constant 0 : i32
    %c0_i32_0 = arith.constant 0 : i32
    %c0_i32_1 = arith.constant 0 : i32
    return %c0_i32, %c0_i32_0 : i32, i32
  }
  func.func @transform_5(%arg0: i32) -> (i32, i32) {
    %c0_i32 = arith.constant 0 : i32
    %c0_i32_0 = arith.constant 0 : i32
    return %arg0, %c0_i32 : i32, i32
  }
}

</mosaic_0001>

<bundles_post_ra>
// kernel: neuralnetwork_forward.1
= control target key start
LH: loop header
LB: loop body
LE: loop exit
PB: predicated region body
PF: predicated region fallthrough
CT: control target
= control target key end

     0   :  { %v1000_v43 = vmov 0.0   ;;  %vm1001_vm0 = vmmov 0   ;;  %vm449_vm1 = vcmask 130048   ;;  %s1227_s0 = inlined_call_operand.vmem [shape: bf16[8,784], index: 0, kind: input, shape index: {}]   ;;  %s1228_s1 = inlined_call_operand.vmem [shape: bf16[784,128], index: 1, kind: input, shape index: {}]   ;;  %s1229_s2 = inlined_call_operand.vmem [shape: f32[1,128], index: 2, kind: input, shape index: {}]   ;;  %s1230_s3 = inlined_call_operand.vmem [shape: bf16[128,128], index: 3, kind: input, shape index: {}]   ;;  %s1231_s4 = inlined_call_operand.vmem [shape: f32[1,128], index: 4, kind: input, shape index: {}]   ;;  %s1232_s5 = inlined_call_operand.hbm [shape: f32[8,128], index: 5, kind: output, shape index: {}]  }
   0x1   :  { %v914_v0 = vld [vmem:[%s1228_s1 + $0x78] sm:$0xff]   ;;  %v918_v4 = vld [vmem:[%s1228_s1 + $0x70] sm:$0xff]   ;;  %v922_v8 = vld [vmem:[%s1228_s1 + $0x68] sm:$0xff]  }
   0x2   :  { %v915_v1 = vld [vmem:[%s1228_s1 + $0x38] sm:$0xff]   ;;  %808 = vmatprep.subr.bf16.mxu0 %v914_v0  ;;  %v919_v5 = vld [vmem:[%s1228_s1 + $0x30] sm:$0xff]   ;;  %v923_v9 = vld [vmem:[%s1228_s1 + $0x28] sm:$0xff]  }
   0x3   :  { %v916_v2 = vld [vmem:[%s1228_s1 + $0xf8] sm:$0xff]   ;;  %809 = vmatpush3.bf16.msra.mxu0 %v915_v1  ;;  %v920_v6 = vld [vmem:[%s1228_s1 + $0xf0] sm:$0xff]   ;;  %v924_v10 = vld [vmem:[%s1228_s1 + $0xe8] sm:$0xff]  }
   0x4   :  { %v917_v3 = vld [vmem:[%s1228_s1 + $0xb8] sm:$0xff]   ;;  %830 = vmatprep.subr.bf16.mxu1 %v916_v2  ;;  %810 = vmatprep.subr.bf16.mxu0 %v918_v4  ;;  %v921_v7 = vld [vmem:[%s1228_s1 + $0xb0] sm:$0xff]   ;;  %v925_v11 = vld [vmem:[%s1228_s1 + $0xa8] sm:$0xff]  }
   0x5   :  { %831 = vmatpush3.bf16.msra.mxu1 %v917_v3  ;;  %v926_v12 = vld [vmem:[%s1228_s1 + $0x60] sm:$0xff]   ;;  %v930_v16 = vld [vmem:[%s1228_s1 + $0x58] sm:$0xff]   ;;  %v934_v20 = vld [vmem:[%s1228_s1 + $0x50] sm:$0xff]  }
   0x6   :  { %832 = vmatprep.subr.bf16.mxu1 %v920_v6  ;;  %v927_v13 = vld [vmem:[%s1228_s1 + $0x20] sm:$0xff]   ;;  %v931_v17 = vld [vmem:[%s1228_s1 + $0x18] sm:$0xff]   ;;  %v935_v21 = vld [vmem:[%s1228_s1 + $0x10] sm:$0xff]  }
   0x7   :  { %811 = vmatpush3.bf16.msra.mxu0 %v919_v5  ;;  %v928_v14 = vld [vmem:[%s1228_s1 + $0xe0] sm:$0xff]   ;;  %v932_v18 = vld [vmem:[%s1228_s1 + $0xd8] sm:$0xff]   ;;  %v936_v22 = vld [vmem:[%s1228_s1 + $0xd0] sm:$0xff]  }
   0x8   :  { %812 = vmatprep.subr.bf16.mxu0 %v922_v8  ;;  %v929_v15 = vld [vmem:[%s1228_s1 + $0xa0] sm:$0xff]   ;;  %v933_v19 = vld [vmem:[%s1228_s1 + $0x98] sm:$0xff]   ;;  %v937_v23 = vld [vmem:[%s1228_s1 + $0x90] sm:$0xff]  }
   0x9   :  { %833 = vmatpush3.bf16.msra.mxu1 %v921_v7  ;;  %v938_v24 = vld [vmem:[%s1228_s1 + $0x48] sm:$0xff]   ;;  %v942_v28 = vld [vmem:[%s1228_s1 + $0x40] sm:$0xff]   ;;  %v948_v35 = vld [vmem:[%s1228_s1 + $0x178] sm:$0xff]  }
   0xa   :  { %834 = vmatprep.subr.bf16.mxu1 %v924_v10  ;;  %v939_v25 = vld [vmem:[%s1228_s1 + $0x8] sm:$0xff]   ;;  %v943_v29 = vld [vmem:[%s1228_s1] sm:$0xff]   ;;  %v951_v39 = vld [vmem:[%s1228_s1 + $0x138] sm:$0xff]  }
   0xb   :  { %813 = vmatpush3.bf16.msra.mxu0 %v923_v9  ;;  %v940_v26 = vld [vmem:[%s1228_s1 + $0xc8] sm:$0xff]   ;;  %v944_v30 = vld [vmem:[%s1228_s1 + $0xc0] sm:$0xff]   ;;  %v952_v40 = vld [vmem:[%s1228_s1 + $0x170] sm:$0xff]  }
   0xc   :  { %814 = vmatprep.subr.bf16.mxu0 %v926_v12  ;;  %v941_v27 = vld [vmem:[%s1228_s1 + $0x88] sm:$0xff]   ;;  %v22_v31 = vld [vmem:[%s1227_s0] sm:$0xff]  ;;  %v953_v41 = vld [vmem:[%s1228_s1 + $0x130] sm:$0xff]  }
   0xd   :  { %835 = vmatpush3.bf16.msra.mxu1 %v925_v11  ;;  %v742_v32 = vcombine.low %v22_v31, %v22_v31  ;;  %v743_v33 = vcombine.high %v22_v31, %v22_v31  ;;  %v947_v34 = vld [vmem:[%s1228_s1 + $0x80] sm:$0xff]   ;;  %v23_v36 = vld [vmem:[%s1227_s0 + $0x8] sm:$0xff]  ;;  %v958_v47 = vld [vmem:[%s1228_s1 + $0x158] sm:$0xff]  }
   0xe   :  { %836 = vmatprep.subr.bf16.mxu1 %v928_v14  ;;  %v744_v37 = vcombine.low %v23_v36, %v23_v36  ;;  %v745_v38 = vcombine.high %v23_v36, %v23_v36  ;;  %v954_v42 = vld [vmem:[%s1228_s1 + $0x168] sm:$0xff]   ;;  %v956_v45 = vld [vmem:[%s1228_s1 + $0x160] sm:$0xff]   ;;  %v959_v48 = vld [vmem:[%s1228_s1 + $0x118] sm:$0xff]  }
   0xf   :  { %815 = vmatpush3.bf16.msra.mxu0 %v927_v13  ;;  %485 = vmatprep.mubr.bf16.mxu0 %v743_v33  ;;  %v955_v44 = vld [vmem:[%s1228_s1 + $0x128] sm:$0xff]   ;;  %v957_v46 = vld [vmem:[%s1228_s1 + $0x120] sm:$0xff]   ;;  %v960_v49 = vld [vmem:[%s1228_s1 + $0x150] sm:$0xff]  }
  0x10   :  { %816 = vmatprep.subr.bf16.mxu0 %v930_v16  ;;  %525 = vmatprep.mubr.bf16.mxu1 %v745_v38  ;;  %v966_v50 = vld [vmem:[%s1228_s1 + $0x180] sm:$0xff]   ;;  %v24_v51 = vld [vmem:[%s1227_s0 + $0x10] sm:$0xff]  ;;  %v969_v54 = vld [vmem:[%s1227_s0 + $0x18] ss:$0 sps:$4 sm:$0xff]  }
  0x11   :  { %837 = vmatpush3.bf16.msra.mxu1 %v929_v15  ;;  %v961_v52 = vld [vmem:[%s1228_s1 + $0x110] sm:$0xff]   ;;  %v747_v53 = vcombine.high %v24_v51, %v24_v51  ;;  %v962_v55 = vld [vmem:[%s1228_s1 + $0x148] sm:$0xff]  }
  0x12   :  { %838 = vmatprep.subr.bf16.mxu1 %v932_v18  ;;  %v963_v56 = vld [vmem:[%s1228_s1 + $0x108] sm:$0xff]  }
  0x13   :  { %817 = vmatpush3.bf16.msra.mxu0 %v931_v17 }
  0x14   :  { %818 = vmatprep.subr.bf16.mxu0 %v934_v20 }
  0x15   :  { %839 = vmatpush3.bf16.msra.mxu1 %v933_v19 }
  0x16   :  { %840 = vmatprep.subr.bf16.mxu1 %v936_v22 }
  0x17   :  { %819 = vmatpush3.bf16.msra.mxu0 %v935_v21 }
  0x18   :  { %820 = vmatprep.subr.bf16.mxu0 %v938_v24 }
  0x19   :  { %841 = vmatpush3.bf16.msra.mxu1 %v937_v23 }
  0x1a   :  { %842 = vmatprep.subr.bf16.mxu1 %v940_v26 }
  0x1b   :  { %821 = vmatpush3.bf16.msra.mxu0 %v939_v25 }
  0x1c   :  { %822 = vmatprep.subr.bf16.mxu0 %v942_v28 }
  0x1d   :  { %843 = vmatpush3.bf16.msra.mxu1 %v941_v27 }
  0x1e   :  { %844 = vmatprep.subr.bf16.mxu1 %v944_v30 }
  0x1f   :  { %823 = vmatpush3.bf16.msra.mxu0 %v943_v29 }
  0x20   :  { %852 = vmatprep.subr.bf16.mxu0 %v948_v35 }
  0x21   :  { %845 = vmatpush3.bf16.msra.mxu1 %v947_v34 }
  0x22   :  { %486 = vmatmul.mubr.bf16.vlgmr.msra.gmra.mxu0 %v742_v32  ;;  %885 = vmatprep.subr.bf16.mxu1 %v1000_v43 }
  0x23   :  { %853 = vmatpush3.bf16.msra.mxu0 %v951_v39  ;;  %565 = vmatprep.mubr.bf16.mxu0 %v747_v53 }
  0x24   :  { %526 = vmatmul.mubr.bf16.vlgmr.msra.gmra.mxu1 %v744_v37  ;;  %854 = vmatprep.subr.bf16.mxu0 %v952_v40 }
  0x25   :  { %887 = vmatprep.mubr.msk.bf16.mxu1 %vm1001_vm0, %v1000_v43  ;;  %886 = vmatpush3.bf16.msra.mxu1 %v966_v50 }
  0x26   :  { %891 = vmatprep.subr.bf16.mxu1 %v1000_v43 }
  0x27   :  { %855 = vmatpush3.bf16.msra.mxu0 %v953_v41 }
  0x28   :  { %856 = vmatprep.subr.bf16.mxu0 %v954_v42 }
  0x2b   :  { %857 = vmatpush3.bf16.msra.mxu0 %v955_v44 }
  0x2c   :  { %858 = vmatprep.subr.bf16.mxu0 %v956_v45  ;;  %888 = vmatmul.mubr.msk.bf16.vlgmr.msra.gmra.mxu1 %vm449_vm1, %v969_v54 }
  0x2d   :  { %907 = vmatprep.mubr.msk.bf16.mxu1 %vm1001_vm0, %v1000_v43 }
  0x2f   :  { %859 = vmatpush3.bf16.msra.mxu0 %v957_v46 }
  0x30   :  { %860 = vmatprep.subr.bf16.mxu0 %v958_v47 }
  0x33   :  { %861 = vmatpush3.bf16.msra.mxu0 %v959_v48 }
  0x34   :  { %862 = vmatprep.subr.bf16.mxu0 %v960_v49 }
  0x37   :  { %863 = vmatpush3.bf16.msra.mxu0 %v961_v52 }
  0x38   :  { %10 = vsyncpa [#allocation3], 0  ;;  %864 = vmatprep.subr.bf16.mxu0 %v962_v55  ;;  %v964_v57 = vld [vmem:[%s1228_s1 + $0x140] sm:$0xff]   ;;  %v746_v59 = vcombine.low %v24_v51, %v24_v51  ;;  %v970_v60 = vld [vmem:[%s1230_s3 + $0x38] sm:$0xff]   ;;  %s1002_s16 = smov [#allocation2]  }
  0x39   :  { %v965_v58 = vld [vmem:[%s1228_s1 + $0x100] sm:$0xff]   ;;  %892 = vmatpush3.bf16.msra.mxu1 %v970_v60  ;;  %v971_v61 = vld [vmem:[%s1230_s3 + $0x30] sm:$0xff]   ;;  %v972_v62 = vld [vmem:[%s1230_s3 + $0x28] sm:$0xff]   ;;  %s733_s17 = sshll.u32 %s1002_s16, 4  ;;  %s734_s17 = int_to_ptr.vmem [resolvable:$true] %s733_s17 }
  0x3a   :  { %893 = vmatprep.subr.bf16.mxu1 %v1000_v43  ;;  %v973_v63 = vld [vmem:[%s1230_s3 + $0x20] sm:$0xff]   ;;  %v974_v0 = vld [vmem:[%s1230_s3 + $0x18] sm:$0xff]   ;;  %v975_v1 = vld [vmem:[%s1230_s3 + $0x10] sm:$0xff]   ;;  %p983_p1 = scmp.lt.s32.totalorder %s734_s17, %s734_s17 }
  0x3b   :  { %865 = vmatpush3.bf16.msra.mxu0 %v963_v56  ;;  %v976_v2 = vld [vmem:[%s1230_s3 + $0x8] sm:$0xff]   ;;  %v977_v3 = vld [vmem:[%s1230_s3] sm:$0xff]  }
  0x3c   :  { %866 = vmatprep.subr.bf16.mxu0 %v964_v57  ;;  %v741_v17 = vld [vmem:[%s1229_s2] ss:$0 sm:$0xff]  ;;  %s978_s2 = scalar_lea.vmem %s734_s17, 128 }
  0x3d   :  { %894 = vmatpush3.bf16.msra.mxu1 %v971_v61  ;;  %v799_v30 = vld [vmem:[%s1231_s4] ss:$0 sm:$0xff]  ;;  %p979_p0 = scmp.ne.s32.totalorder %s734_s17, %s978_s2  ;;  %p984_p2 = scmp.lt.s32.totalorder %s978_s2, %s978_s2 }
  0x3e   :  { %895 = vmatprep.subr.bf16.mxu1 %v1000_v43 }
  0x3f   :  { %867 = vmatpush3.bf16.msra.mxu0 %v965_v58  ;;  %p985_p3 = por %p984_p2, %p983_p1 }
  0x41   :  { %896 = vmatpush3.bf16.msra.mxu1 %v972_v62  ;;  %p986_p4 = pnand %p985_p3, %p979_p0 }
  0x42   :  { %566 = vmatmul.mubr.bf16.vlgmr.msra.gmra.mxu0 %v746_v59  ;;  %897 = vmatprep.subr.bf16.mxu1 %v1000_v43 }
  0x45   :  { %898 = vmatpush3.bf16.msra.mxu1 %v973_v63 }
  0x46   :  { %899 = vmatprep.subr.bf16.mxu1 %v1000_v43 }
  0x49   :  { %900 = vmatpush3.bf16.msra.mxu1 %v974_v0 }
  0x4a   :  { %901 = vmatprep.subr.bf16.mxu1 %v1000_v43 }
  0x4d   :  { %902 = vmatpush3.bf16.msra.mxu1 %v975_v1 }
  0x4e   :  { %903 = vmatprep.subr.bf16.mxu1 %v1000_v43 }
  0x51   :  { %904 = vmatpush3.bf16.msra.mxu1 %v976_v2 }
  0x52   :  { %905 = vmatprep.subr.bf16.mxu1 %v1000_v43 }
  0x55   :  { %906 = vmatpush3.bf16.msra.mxu1 %v977_v3 }
  0xe2   :  { %v824_v4 = vpop.f32.mrf.mxu0 }
  0xe4   :  { %v825_v5 = vpop.f32.mrf.mxu0  ;;  %v846_v6 = vpop.f32.mrf.mxu1 }
  0xe5   :  { %v826_v16 = vadd.f32 %v825_v5, %v824_v4 }
  0xe6   :  { %v827_v7 = vpop.f32.mrf.mxu0  ;;  %v847_v8 = vpop.f32.mrf.mxu1 }
  0xe7   :  { %v488_v18 = vadd.f32 %v826_v16, %v741_v17  ;;  %v848_v19 = vadd.f32 %v847_v8, %v846_v6 }
  0xe8   :  { %v828_v9 = vpop.f32.mrf.mxu0  ;;  %v849_v10 = vpop.f32.mrf.mxu1 }
  0xe9   :  { %v528_v22 = vadd.f32 %v848_v19, %v488_v18 }
  0xea   :  { %v850_v11 = vpop.f32.mrf.mxu1 }
  0xec   :  { %v607_v12 = vpop.f32.mrf.mxu1 }
  0xee   :  { %v889_v13 = vpop.f32.mrf.mxu1 }
  0xf0   :  { %v610_v14 = vpop.f32.mrf.mxu1 }
  0xf2   :  { %v890_v15 = vpop.f32.mrf.mxu1 }
 0x102   :  { %v868_v20 = vpop.f32.mrf.mxu0 }
 0x104   :  { %v869_v21 = vpop.f32.mrf.mxu0 }
 0x105   :  { %v870_v23 = vadd.f32 %v869_v21, %v868_v20 }
 0x106   :  { %v871_v24 = vpop.f32.mrf.mxu0 }
 0x107   :  { %v568_v25 = vadd.f32 %v870_v23, %v528_v22 }
 0x108   :  { %v872_v26 = vpop.f32.mrf.mxu0 }
 0x109   :  { %v608_v27 = vadd.f32 %v607_v12, %v568_v25 }
 0x10b   :  { %v613_v28 = vmax.f32 %v608_v27, 0.0 }
 0x10d   :  { %v614_v29 = vpack.c.bf16 %v613_v28, %v613_v28 }
 0x10f   :  { %908 = vmatmul.mubr.bf16.vlgmr.msra.gmra.mxu1 %v614_v29 }
 0x1cf   :  { %v720_v31 = vpop.f32.mrf.mxu1 }
 0x1d0   :  { %v721_v32 = vadd.f32 %v799_v30, %v720_v31 }
 0x1d1   :  { %v909_v33 = vpop.f32.mrf.mxu1 }
 0x1d2   :  { %726 = vst [vmem:[#allocation2] sm:$0xff] %v721_v32 }
 0x1d3   :  { %v723_v34 = vpop.f32.mrf.mxu1 }
 0x1d4   :  { %989 = shalt.err (!%p986_p4)
}
 0x1d5   :  { %736 = dma.vmem_to_hbm [thread:$0]  %s734_s17, 128, %s1232_s5, [#allocation3]   ;;  %v910_v35 = vpop.f32.mrf.mxu1 }
 0x1d6   :  { %998 = dma.done.wait [#allocation3], 128  }
 0x1d7   :  { %999 = vsyncadd [#allocation3], 4294967168 }
 0x1d8   :  { %740 = vsyncpa [#allocation3], 1 }

</bundles_post_ra>
